<compile_context>
chip_gen: v5e
topology: v5e:2x2
jax: 0.10.0
libtpu: 0.0.40
codegen_flags: <defaults>
</compile_context>

<pallas_src>
import jax
import jax.numpy as jnp
from jax.experimental import pallas as pl
from jax.experimental.pallas import tpu as pltpu

LANE = 128


def _mlp_kernel(x_ref, w1_ref, b1_ref, w2_ref, b2_ref, o_ref):
    x = x_ref[...]          # (tile_n, input_dim)   input_dim is tiny (2)
    w1 = w1_ref[...]        # (input_dim, H_pad)
    # First linear as unrolled broadcast FMAs on the VPU (skip the MXU:
    # a K=2 contraction would be almost pure fill/drain latency).
    h = jnp.broadcast_to(b1_ref[...], (x.shape[0], w1.shape[1]))
    for k in range(x.shape[1]):          # static unroll; input_dim is small
        h = h + x[:, k:k + 1] * w1[k:k + 1, :]
    h = jnp.maximum(h, 0.0)              # ReLU, (tile_n, H_pad)
    # Second linear (H -> 1) as VPU multiply + XLU lane reduction; padded
    # lanes of w2 are zero so they contribute nothing.
    y = jnp.sum(h * w2_ref[...], axis=-1, keepdims=True) + b2_ref[0, 0]
    # Lane-dense store: broadcast the per-row scalar across all 128 lanes.
    o_ref[...] = jnp.broadcast_to(y, o_ref.shape).astype(o_ref.dtype)


def dual_variable_forward(x, w1_t, b1, w2_t, b2, *, tile_n=1024):
    """x: (N, input_dim); w1_t: (input_dim, hidden); b1: (1, hidden) or (hidden,);
    w2_t: (hidden, 1); b2: (1, 1).  Returns (N, 1) float32."""
    n, d = x.shape
    hid = w1_t.shape[1]
    h_pad = max(LANE, pl.cdiv(hid, LANE) * LANE)

    # Zero-pad the hidden dimension to a full lane multiple (numerics
    # unchanged: padded w2 lanes are zero so the reduction ignores them).
    w1p = jnp.zeros((d, h_pad), jnp.float32).at[:, :hid].set(
        w1_t.astype(jnp.float32))
    b1p = jnp.zeros((1, h_pad), jnp.float32).at[:, :hid].set(
        jnp.asarray(b1, jnp.float32).reshape(1, hid))
    w2row = jnp.zeros((1, h_pad), jnp.float32).at[:, :hid].set(
        jnp.asarray(w2_t, jnp.float32).reshape(1, hid))
    b2s = jnp.asarray(b2, jnp.float32).reshape(1, 1)

    # Batch tile: multiple of 8 sublanes; sized well under v7x's 64 MiB VMEM
    # (a (1024, 128) f32 slab double-buffered is ~1 MiB).
    tile_n = int(min(tile_n, max(8, pl.cdiv(n, 8) * 8)))
    n_pad = pl.cdiv(n, tile_n) * tile_n
    xp = x.astype(jnp.float32)
    if n_pad != n:
        xp = jnp.zeros((n_pad, d), jnp.float32).at[:n, :].set(xp)

    out = pl.pallas_call(
        _mlp_kernel,
        out_shape=jax.ShapeDtypeStruct((n_pad, LANE), jnp.float32),
        grid_spec=pl.GridSpec(
            grid=(n_pad // tile_n,),
            in_specs=[
                pl.BlockSpec((tile_n, d), lambda i: (i, 0)),      # x tile
                pl.BlockSpec((d, h_pad), lambda i: (0, 0)),       # w1 resident
                pl.BlockSpec((1, h_pad), lambda i: (0, 0)),       # b1 resident
                pl.BlockSpec((1, h_pad), lambda i: (0, 0)),       # w2 row
                pl.BlockSpec(memory_space=pltpu.MemorySpace.SMEM),  # b2 scalar
            ],
            out_specs=pl.BlockSpec((tile_n, LANE), lambda i: (i, 0)),
        ),
        compiler_params=pltpu.CompilerParams(
            dimension_semantics=("parallel",)),
    )(xp, w1p, b1p, w2row, b2s)

    # Lane-dense slab -> (N, 1) column (plain XLA slice in the wrapper).
    return out[:n, :1]


if __name__ == "__main__":
    input_dim = 2
    hidden_dim = 100
    batch = 8

    key = jax.random.PRNGKey(0)
    kx, kw1, kb1, kw2, kb2 = jax.random.split(key, 5)

    # Deterministic synthetic parameters (shapes match nn.Linear(input_dim,
    # hidden_dim) and nn.Linear(hidden_dim, 1); stored pre-transposed).
    x = jax.random.normal(kx, (batch, input_dim), dtype=jnp.float32)
    w1_t = jax.random.normal(kw1, (input_dim, hidden_dim), dtype=jnp.float32) * 0.1
    b1 = jax.random.normal(kb1, (1, hidden_dim), dtype=jnp.float32) * 0.1
    w2_t = jax.random.normal(kw2, (hidden_dim, 1), dtype=jnp.float32) * 0.1
    b2 = jax.random.normal(kb2, (1, 1), dtype=jnp.float32) * 0.1

    y = dual_variable_forward(x, w1_t, b1, w2_t, b2)
    y = jax.block_until_ready(y)

    # Pure-JAX reference check of the forward pass.
    ref = jnp.maximum(x @ w1_t + b1, 0.0) @ w2_t + b2
    assert y.shape == (batch, 1)
    assert jnp.allclose(y, ref, atol=1e-5, rtol=1e-5)

    # TODO(synk): enforce_lipschitz / spectral_normalisation / weight_clipping
    # are training-time parameter updates, not part of forward(); not kernelized.
    print("KERNEL_OK")
</pallas_src>

<mosaic_0001>
module attributes {stable_mosaic.version = 11 : i64} {
  func.func @_mlp_kernel(%arg0: i32, %arg1: memref<8x2xf32, #tpu.memory_space<vmem>>, %arg2: memref<2x128xf32, #tpu.memory_space<vmem>>, %arg3: memref<1x128xf32, #tpu.memory_space<vmem>>, %arg4: memref<1x128xf32, #tpu.memory_space<vmem>>, %arg5: memref<1x1xf32, #tpu.memory_space<smem>>, %arg6: memref<8x128xf32, #tpu.memory_space<vmem>>) attributes {dimension_semantics = [#tpu.dimension_semantics<parallel>], iteration_bounds = array<i64: 1>, scalar_prefetch = 0 : i64, scratch_operands = 0 : i64, tpu.core_type = #tpu.core_type<tc>, window_params = [{transform_indices = @transform_0, window_bounds = array<i64: 8, 2>}, {pipeline_mode = #tpu.pipeline_mode<synchronous>, transform_indices = @transform_1, window_bounds = array<i64: 2, 128>}, {pipeline_mode = #tpu.pipeline_mode<synchronous>, transform_indices = @transform_2, window_bounds = array<i64: 1, 128>}, {pipeline_mode = #tpu.pipeline_mode<synchronous>, transform_indices = @transform_3, window_bounds = array<i64: 1, 128>}, {transform_indices = @transform_4, window_bounds = array<i64: 1, 1>}, {transform_indices = @transform_5, window_bounds = array<i64: 8, 128>}]} {
    %c0 = arith.constant 0 : index
    %c0_0 = arith.constant 0 : index
    %0 = vector.load %arg1[%c0, %c0_0] : memref<8x2xf32, #tpu.memory_space<vmem>>, vector<8x2xf32>
    %c0_1 = arith.constant 0 : index
    %c0_2 = arith.constant 0 : index
    %1 = vector.load %arg2[%c0_1, %c0_2] : memref<2x128xf32, #tpu.memory_space<vmem>>, vector<2x128xf32>
    %c0_3 = arith.constant 0 : index
    %c0_4 = arith.constant 0 : index
    %2 = vector.load %arg3[%c0_3, %c0_4] : memref<1x128xf32, #tpu.memory_space<vmem>>, vector<1x128xf32>
    %3 = vector.shape_cast %2 : vector<1x128xf32> to vector<1x128xf32>
    %4 = vector.broadcast %3 : vector<1x128xf32> to vector<8x128xf32>
    %5 = vector.extract_strided_slice %0 {offsets = [0, 0], sizes = [8, 1], strides = [1, 1]} : vector<8x2xf32> to vector<8x1xf32>
    %6 = vector.extract_strided_slice %1 {offsets = [0, 0], sizes = [1, 128], strides = [1, 1]} : vector<2x128xf32> to vector<1x128xf32>
    %7 = vector.broadcast %5 : vector<8x1xf32> to vector<8x128xf32>
    %8 = vector.broadcast %6 : vector<1x128xf32> to vector<8x128xf32>
    %9 = arith.mulf %7, %8 : vector<8x128xf32>
    %10 = arith.addf %4, %9 : vector<8x128xf32>
    %11 = vector.extract_strided_slice %0 {offsets = [0, 1], sizes = [8, 1], strides = [1, 1]} : vector<8x2xf32> to vector<8x1xf32>
    %12 = vector.extract_strided_slice %1 {offsets = [1, 0], sizes = [1, 128], strides = [1, 1]} : vector<2x128xf32> to vector<1x128xf32>
    %13 = vector.broadcast %11 : vector<8x1xf32> to vector<8x128xf32>
    %14 = vector.broadcast %12 : vector<1x128xf32> to vector<8x128xf32>
    %15 = arith.mulf %13, %14 : vector<8x128xf32>
    %16 = arith.addf %10, %15 : vector<8x128xf32>
    %cst = arith.constant 0.000000e+00 : f32
    %17 = vector.broadcast %cst : f32 to vector<8x128xf32>
    %18 = arith.maximumf %16, %17 : vector<8x128xf32>
    %c0_5 = arith.constant 0 : index
    %c0_6 = arith.constant 0 : index
    %19 = vector.load %arg4[%c0_5, %c0_6] : memref<1x128xf32, #tpu.memory_space<vmem>>, vector<1x128xf32>
    %20 = vector.broadcast %19 : vector<1x128xf32> to vector<8x128xf32>
    %21 = arith.mulf %18, %20 : vector<8x128xf32>
    %cst_7 = arith.constant dense<0.000000e+00> : vector<8xf32>
    %22 = vector.multi_reduction <add>, %21, %cst_7 [1] : vector<8x128xf32> to vector<8xf32>
    %23 = vector.shape_cast %22 : vector<8xf32> to vector<8x1xf32>
    %c0_8 = arith.constant 0 : index
    %c0_9 = arith.constant 0 : index
    %24 = memref.load %arg5[%c0_8, %c0_9] : memref<1x1xf32, #tpu.memory_space<smem>>
    %25 = vector.broadcast %24 : f32 to vector<8x1xf32>
    %26 = arith.addf %23, %25 : vector<8x1xf32>
    %27 = vector.shape_cast %26 : vector<8x1xf32> to vector<8x1xf32>
    %28 = vector.broadcast %27 : vector<8x1xf32> to vector<8x128xf32>
    %c0_10 = arith.constant 0 : index
    %c0_11 = arith.constant 0 : index
    %29 = vector.load %arg6[%c0_10, %c0_11] : memref<8x128xf32, #tpu.memory_space<vmem>>, vector<8x128xf32>
    tpu.vector_store %arg6[%c0_10, %c0_11], %28 {strides = array<i32>} : memref<8x128xf32, #tpu.memory_space<vmem>>, vector<8x128xf32>,
    return
  }
  func.func @transform_0(%arg0: i32) -> (i32, i32) {
    %c0_i32 = arith.constant 0 : i32
    %c0_i32_0 = arith.constant 0 : i32
    return %arg0, %c0_i32 : i32, i32
  }
  func.func @transform_1(%arg0: i32) -> (i32, i32) {
    %c0_i32 = arith.constant 0 : i32
    %c0_i32_0 = arith.constant 0 : i32
    %c0_i32_1 = arith.constant 0 : i32
    return %c0_i32, %c0_i32_0 : i32, i32
  }
  func.func @transform_2(%arg0: i32) -> (i32, i32) {
    %c0_i32 = arith.constant 0 : i32
    %c0_i32_0 = arith.constant 0 : i32
    %c0_i32_1 = arith.constant 0 : i32
    return %c0_i32, %c0_i32_0 : i32, i32
  }
  func.func @transform_3(%arg0: i32) -> (i32, i32) {
    %c0_i32 = arith.constant 0 : i32
    %c0_i32_0 = arith.constant 0 : i32
    %c0_i32_1 = arith.constant 0 : i32
    return %c0_i32, %c0_i32_0 : i32, i32
  }
  func.func @transform_4(%arg0: i32) -> (i32, i32) {
    %c0_i32 = arith.constant 0 : i32
    %c0_i32_0 = arith.constant 0 : i32
    %c0_i32_1 = arith.constant 0 : i32
    return %c0_i32, %c0_i32_0 : i32, i32
  }
  func.func @transform_5(%arg0: i32) -> (i32, i32) {
    %c0_i32 = arith.constant 0 : i32
    %c0_i32_0 = arith.constant 0 : i32
    return %arg0, %c0_i32 : i32, i32
  }
}

</mosaic_0001>

<bundles_post_ra>
// kernel: tpu_custom_call.1
= control target key start
LH: loop header
LB: loop body
LE: loop exit
PB: predicated region body
PF: predicated region fallthrough
CT: control target
= control target key end

     0   :  { %v104_v1 = vmov 0   ;;  %s155_s0 = inlined_call_operand.vmem [shape: f32[8,2], index: 0, kind: input, shape index: {}]   ;;  %s156_s1 = inlined_call_operand.vmem [shape: f32[2,128], index: 1, kind: input, shape index: {}]   ;;  %s157_s2 = inlined_call_operand.vmem [shape: f32[1,128], index: 2, kind: input, shape index: {}]   ;;  %s158_s3 = inlined_call_operand.vmem [shape: f32[1,128], index: 3, kind: input, shape index: {}]   ;;  %s159_s4 = inlined_call_operand.<no memory space> [shape: f32[1,1], index: 4, kind: input, shape index: {}]   ;;  %s160_s5 = inlined_call_operand.hbm [shape: f32[8,128], index: 5, kind: output, shape index: {}]  }
   0x1   :  { %v22_v0 = vld [vmem:[%s155_s0] sm:$0xff]  ;;  %74 = vset.pattern.permute.xlu0 %v104_v1 }
   0x2   :  { %30 = vperm.xlu0 %74, %v22_v0  }
   0x3   :  { %11 = vsyncpa [#allocation4], 0  ;;  %v105_v2 = vmov 1   ;;  %v23_v3 = vld [vmem:[%s156_s1] sm:$0x3]  ;;  %v52_v16 = vstv %s159_s4  ;;  %s106_s26 = smov [#allocation3]  }
   0x4   :  { %v33_v5 = vperm.slane %v23_v3, 0  ;;  %v76_v6 = vld [vmem:[%s157_s2] ss:$0 sm:$0xff]  ;;  %v40_v8 = vperm.slane %v23_v3, 1  ;;  %s60_s27 = sshll.u32 %s106_s26, 4  ;;  %s62_s29 = sshll.u32 %s160_s5, 4  ;;  %s61_s27 = int_to_ptr.vmem [resolvable:$true] %s60_s27  ;;  %s63_s29 = int_to_ptr.hbm [resolvable:$true] %s62_s29 }
   0x5   :  { %v77_v13 = vld [vmem:[%s158_s3] ss:$0 sm:$0xff] }
   0xa   :  { %75 = vset.pattern.permute.xlu0 %v105_v2 }
   0xb   :  { %37 = vperm.xlu0 %75, %v22_v0  }
  0x74   :  { %v31_v4 = vpop.permute.xlu0 %30 }
  0x75   :  { %v34_v7 = vmul.f32 %v33_v5, %v31_v4 }
  0x77   :  { %v35_v10 = vadd.f32 %v76_v6, %v34_v7 }
  0x7d   :  { %v38_v9 = vpop.permute.xlu0 %37 }
  0x7e   :  { %v41_v11 = vmul.f32 %v40_v8, %v38_v9 }
  0x80   :  { %v42_v12 = vadd.f32 %v41_v11, %v35_v10 }
  0x82   :  { %v43_v14 = vmax.f32 %v42_v12, 0.0 }
  0x84   :  { %v48_v15 = vmul.f32 %v77_v13, %v43_v14 }
  0x86   :  { %49 = vadd.xlane.f32.xlu1 %v48_v15 }
  0xf9   :  { %v50_v17 = vpop.xlane.xlu1 %49 }
  0xfa   :  { %v53_v18 = vadd.f32 %v52_v16, %v50_v17 }
  0xfc   :  { %54 = vst [vmem:[#allocation3] sm:$0xff] %v53_v18 }
  0xfd   :  { %65 = dma.vmem_to_hbm [thread:$0]  %s61_s27, 128, %s63_s29, [#allocation4]  }
  0xfe   :  { %102 = dma.done.wait [#allocation4], 128  }
  0xff   :  { %103 = vsyncadd [#allocation4], 4294967168 }
 0x100   :  { %70 = vsyncpa [#allocation4], 1 }

</bundles_post_ra>
